<compile_context>
chip_gen: v7x
topology: tpu7x:2x2x1
jax: 0.10.0
libtpu: 0.0.40
codegen_flags: <defaults>
</compile_context>

<pallas_src>
import math

import jax
import jax.numpy as jnp
from jax import lax
from jax.experimental import pallas as pl
from jax.experimental.pallas import tpu as pltpu


def _round_up(v, m):
    return ((v + m - 1) // m) * m


def _pos_emb_matmul_kernel(x_ref, m_ref, out_ref):
    """group > 1: tiny f32 MXU matmul does broadcast + scale + phase add.

    x_ref:   (TILE_BP, group+1) f32  -- `group` packed timesteps + a ones column
    m_ref:   (group+1, W) f32        -- row j: freq masked to lane segment j;
                                        last row: phase (0 for sin half, pi/2 for cos half)
    out_ref: (TILE_BP, W) f32, W = group * dim (multiple of 128 -> lane-dense stores)
    """
    a = jnp.dot(x_ref[...], m_ref[...],
                preferred_element_type=jnp.float32,
                precision=lax.Precision.HIGHEST)       # keep the contraction in f32
    out_ref[...] = jnp.sin(a)                          # cos == sin(a + pi/2) via phase row


def _pos_emb_bcast_kernel(x_ref, tab_ref, out_ref):
    """group == 1 (dim is a multiple of 128): pure broadcast, no select loop, no MXU.

    x_ref:   (TILE_BP, 1) f32
    tab_ref: (2, W) f32  -- row 0: freq table, row 1: phase table
    out_ref: (TILE_BP, W) f32, W = dim
    """
    out_ref[...] = jnp.sin(x_ref[...] * tab_ref[0:1, :] + tab_ref[1:2, :])


def sinusoidal_pos_emb(x, dim):
    """JAX/Pallas equivalent of SinusoidalPosEmb(dim)(x).

    Args:
      x:   (B,) timesteps (any float/int dtype; cast to float32).
      dim: embedding dimension (even, >= 4).
    Returns:
      (B, dim) float32 embedding.
    """
    assert dim % 2 == 0 and dim >= 4, "dim must be even and >= 4"
    half_dim = dim // 2
    scale = math.log(10000.0) / (half_dim - 1)
    b = x.shape[0]

    # Lane-dense packing: W = group*dim is a multiple of 128 (lcm rule also covers
    # dim = 48, 96, 160, ...).  Cap group at 32; rare odd dims fall back to group=1.
    group = math.lcm(dim, 128) // dim
    if group > 32:
        group = 1  # TODO(synk): masked (non-128-multiple) stores for these rare dims.
    w = group * dim

    # Column-only tables (computed once, outside the kernel).
    col = jnp.arange(w, dtype=jnp.int32)
    pos = col % dim                                               # position within dim
    freq = jnp.exp(-(pos % half_dim).astype(jnp.float32) * scale)            # (w,)
    phase = jnp.where(pos >= half_dim, jnp.float32(0.5 * math.pi),
                      jnp.float32(0.0))                                       # (w,)

    # Pack `group` timesteps per output row; pad row count to a multiple of 8 so the
    # last tile's stores are not sublane-masked.
    bp = pl.cdiv(b, group)
    bp_pad = _round_up(max(bp, 1), 8)
    xf = x.astype(jnp.float32)
    xf = jnp.pad(xf, (0, bp_pad * group - b))
    x_packed = xf.reshape(bp_pad, group)

    # Tile rows: as big as VMEM comfortably allows (kernel is HBM-write bound), but
    # keep >= 2 grid steps for large batches so v7x's two TensorCores both get work.
    tile_rows = min(2048, max(8, ((1 << 20) // w) // 8 * 8))      # ~4 MiB out tile max
    tile_bp = min(tile_rows, bp_pad)
    if bp_pad > 512 and tile_bp >= bp_pad:
        tile_bp = _round_up(pl.cdiv(bp_pad, 2), 8)
    grid = (pl.cdiv(bp_pad, tile_bp),)

    cparams = pltpu.CompilerParams(dimension_semantics=("parallel",))

    if group > 1:
        # M[j, c] = freq[c] if (c // dim) == j else 0 ;  M[group, c] = phase[c].
        seg = (col // dim)[None, :]                                           # (1, w)
        m_freq = jnp.where(
            jnp.arange(group, dtype=jnp.int32)[:, None] == seg,
            freq[None, :], jnp.float32(0.0))                                  # (group, w)
        m_tab = jnp.concatenate([m_freq, phase[None, :]], axis=0)             # (group+1, w)
        x_aug = jnp.concatenate(
            [x_packed, jnp.ones((bp_pad, 1), jnp.float32)], axis=1)           # (bp_pad, group+1)

        out_packed = pl.pallas_call(
            _pos_emb_matmul_kernel,
            out_shape=jax.ShapeDtypeStruct((bp_pad, w), jnp.float32),
            grid=grid,
            in_specs=[
                pl.BlockSpec((tile_bp, group + 1), lambda i: (i, 0)),  # packed timesteps + ones
                pl.BlockSpec((group + 1, w), lambda i: (0, 0)),        # freq/phase matrix
            ],
            out_specs=pl.BlockSpec((tile_bp, w), lambda i: (i, 0)),
            compiler_params=cparams,
        )(x_aug, m_tab)
    else:
        tab = jnp.stack([freq, phase], axis=0)                                # (2, w)
        out_packed = pl.pallas_call(
            _pos_emb_bcast_kernel,
            out_shape=jax.ShapeDtypeStruct((bp_pad, w), jnp.float32),
            grid=grid,
            in_specs=[
                pl.BlockSpec((tile_bp, 1), lambda i: (i, 0)),          # one timestep per row
                pl.BlockSpec((2, w), lambda i: (0, 0)),                # merged freq+phase table
            ],
            out_specs=pl.BlockSpec((tile_bp, w), lambda i: (i, 0)),
            compiler_params=cparams,
        )(x_packed, tab)

    # Row-major (bp_pad, group*dim) has the same memory layout as (bp_pad*group, dim).
    return out_packed.reshape(bp_pad * group, dim)[:b]


def _reference(x, dim):
    half_dim = dim // 2
    emb = math.log(10000.0) / (half_dim - 1)
    freqs = jnp.exp(jnp.arange(half_dim, dtype=jnp.float32) * -emb)
    args = x.astype(jnp.float32)[:, None] * freqs[None, :]
    return jnp.concatenate([jnp.sin(args), jnp.cos(args)], axis=-1)


if __name__ == "__main__":
    key = jax.random.PRNGKey(0)
    batch = 8
    # Diffusion timesteps: positive floats up to ~1000, deterministic.
    x = jax.random.uniform(key, (batch,), dtype=jnp.float32) * 1000.0

    # Main case (module's `dim`): dim=32 -> group=4 packed rows -> MXU path.
    dim = 32
    out = jax.block_until_ready(sinusoidal_pos_emb(x, dim))
    ref = _reference(x, dim)
    assert out.shape == (batch, dim), out.shape
    # cos is computed as sin(a + pi/2); for |a| ~ 1e3 the f32 phase add bounds the
    # deviation at ~1e-4, so compare at 1e-3.
    err = float(jnp.max(jnp.abs(out - ref)))
    assert jnp.allclose(out, ref, atol=1e-3, rtol=1e-3), f"mismatch (dim=32): {err}"

    # group == 1 broadcast path (dim a multiple of 128).
    dim2 = 256
    out2 = jax.block_until_ready(sinusoidal_pos_emb(x, dim2))
    ref2 = _reference(x, dim2)
    assert out2.shape == (batch, dim2), out2.shape
    err2 = float(jnp.max(jnp.abs(out2 - ref2)))
    assert jnp.allclose(out2, ref2, atol=1e-3, rtol=1e-3), f"mismatch (dim=256): {err2}"

    print("KERNEL_OK")
</pallas_src>

<mosaic_0001>
module attributes {stable_mosaic.version = 11 : i64} {
  func.func @_pos_emb_matmul_kernel(%arg0: i32, %arg1: memref<8x5xf32, #tpu.memory_space<vmem>>, %arg2: memref<5x128xf32, #tpu.memory_space<vmem>>, %arg3: memref<8x128xf32, #tpu.memory_space<vmem>>) attributes {dimension_semantics = [#tpu.dimension_semantics<parallel>], iteration_bounds = array<i64: 1>, scalar_prefetch = 0 : i64, scratch_operands = 0 : i64, tpu.core_type = #tpu.core_type<tc>, window_params = [{transform_indices = @transform_0, window_bounds = array<i64: 8, 5>}, {pipeline_mode = #tpu.pipeline_mode<synchronous>, transform_indices = @transform_1, window_bounds = array<i64: 5, 128>}, {transform_indices = @transform_2, window_bounds = array<i64: 8, 128>}]} {
    %c0 = arith.constant 0 : index
    %c0_0 = arith.constant 0 : index
    %0 = vector.load %arg1[%c0, %c0_0] : memref<8x5xf32, #tpu.memory_space<vmem>>, vector<8x5xf32>
    %c0_1 = arith.constant 0 : index
    %c0_2 = arith.constant 0 : index
    %1 = vector.load %arg2[%c0_1, %c0_2] : memref<5x128xf32, #tpu.memory_space<vmem>>, vector<5x128xf32>
    %cst = arith.constant dense<0.000000e+00> : vector<8x128xf32>
    %2 = tpu.matmul %0, %1, %cst {dimension_numbers = #tpu.dot_dimension_numbers<[1], [0], [0], [1], [0, 0, 1, 1], [], []>, precision = #tpu.contract_precision<fp32>} : vector<8x5xf32>, vector<5x128xf32>, vector<8x128xf32> -> vector<8x128xf32>
    %3 = math.sin %2 : vector<8x128xf32>
    %c0_3 = arith.constant 0 : index
    %c0_4 = arith.constant 0 : index
    %4 = vector.load %arg3[%c0_3, %c0_4] : memref<8x128xf32, #tpu.memory_space<vmem>>, vector<8x128xf32>
    tpu.vector_store %arg3[%c0_3, %c0_4], %3 {strides = array<i32>} : memref<8x128xf32, #tpu.memory_space<vmem>>, vector<8x128xf32>,
    return
  }
  func.func @transform_0(%arg0: i32) -> (i32, i32) {
    %c0_i32 = arith.constant 0 : i32
    %c0_i32_0 = arith.constant 0 : i32
    return %arg0, %c0_i32 : i32, i32
  }
  func.func @transform_1(%arg0: i32) -> (i32, i32) {
    %c0_i32 = arith.constant 0 : i32
    %c0_i32_0 = arith.constant 0 : i32
    %c0_i32_1 = arith.constant 0 : i32
    return %c0_i32, %c0_i32_0 : i32, i32
  }
  func.func @transform_2(%arg0: i32) -> (i32, i32) {
    %c0_i32 = arith.constant 0 : i32
    %c0_i32_0 = arith.constant 0 : i32
    return %arg0, %c0_i32 : i32, i32
  }
}

</mosaic_0001>

<bundles_post_ra>
// kernel: tpu_custom_call.1
= control target key start
LH: loop header
LB: loop body
LE: loop exit
PB: predicated region body
PF: predicated region fallthrough
CT: control target
= control target key end

     0   :  { %7 = vsyncpa [#allocation3], 0  ;;  %s848_s0 = inlined_call_operand.hbm [shape: f32[8,5], index: 0, kind: input, shape index: {}]   ;;  %s849_s1 = inlined_call_operand.hbm [shape: f32[5,128], index: 1, kind: input, shape index: {}]   ;;  %s850_s2 = inlined_call_operand.hbm [shape: f32[8,128], index: 2, kind: output, shape index: {}]  }
   0x1   :  { %8 = vsyncpa [#allocation6], 0 }
   0x2   :  { %9 = vsyncpa [#allocation4], 0  ;;  %s759_s9 = smov [#allocation2]   ;;  %s760_s11 = smov [#allocation5]  }
   0x3   :  { %s16_s10 = sshll.u32 %s759_s9, 4  ;;  %s26_s12 = sshll.u32 %s760_s11, 4  ;;  %s17_s10 = int_to_ptr.vmem [resolvable:$true] %s16_s10  ;;  %s27_s12 = int_to_ptr.vmem [resolvable:$true] %s26_s12 }
   0x4   :  { %s687_s15 = scalar_lea.hbm %s848_s0, 128 }
   0x5   :  { %p688_p0 = scmp.ne.s32.totalorder %s848_s0, %s687_s15  ;;  %p691_p1 = scmp.lt.u32.totalorder %s687_s15, %s848_s0 }
   0x7   :  { %p693_p2 = pnand %p691_p1, %p688_p0 }
   0x9   :  { %696 = shalt.err (!%p693_p2)
}
   0xa   :  { %s697_s20 = scalar_lea.vmem %s17_s10, 128  ;;  %p702_p4 = scmp.lt.s32.totalorder %s17_s10, %s17_s10 }
   0xb   :  { %p698_p3 = scmp.ne.s32.totalorder %s17_s10, %s697_s20  ;;  %p703_p5 = scmp.lt.s32.totalorder %s697_s20, %s697_s20 }
   0xd   :  { %p704_p6 = por %p703_p5, %p702_p4 }
   0xf   :  { %p705_p7 = pnand %p704_p6, %p698_p3 }
  0x11   :  { %708 = shalt.err (!%p705_p7)
}
  0x12   :  { %19 = dma.hbm_to_vmem [thread:$0]  %s848_s0, 128, %s17_s10, [#allocation3]  }
  0x13   :  { %s709_s25 = scalar_lea.hbm %s849_s1, 128 }
  0x14   :  { %p710_p8 = scmp.ne.s32.totalorder %s849_s1, %s709_s25  ;;  %p713_p9 = scmp.lt.u32.totalorder %s709_s25, %s849_s1 }
  0x16   :  { %p715_p10 = pnand %p713_p9, %p710_p8 }
  0x18   :  { %718 = shalt.err (!%p715_p10)
}
  0x19   :  { %s719_s30 = scalar_lea.vmem %s27_s12, 128  ;;  %p724_p12 = scmp.lt.s32.totalorder %s27_s12, %s27_s12 }
  0x1a   :  { %p720_p11 = scmp.ne.s32.totalorder %s27_s12, %s719_s30  ;;  %p725_p13 = scmp.lt.s32.totalorder %s719_s30, %s719_s30 }
  0x1c   :  { %p726_p0 = por %p725_p13, %p724_p12 }
  0x1e   :  { %p727_p1 = pnand %p726_p0, %p720_p11 }
  0x20   :  { %730 = shalt.err (!%p727_p1)
}
  0x21   :  { %29 = dma.hbm_to_vmem [thread:$0]  %s849_s1, 128, %s27_s12, [#allocation6]  }
  0x22   :  { %753 = dma.done.wait [#allocation3], 128  }
  0x23   :  { %754 = vsyncadd [#allocation3], 4294967168 }
  0x24   :  { %755 = dma.done.wait [#allocation6], 128  }
  0x25   :  { %756 = vsyncadd [#allocation6], 4294967168  ;;  %v761_v0 = vmov 0.0   ;;  %vm762_vm0 = vmmov 0   ;;  %vm42_vm1 = vcmask 1044480   ;;  %vm38_vm2 = vcmask 39936  }
  0x26   :  { %644 = vmatprep.subr.mxu0 %v761_v0  ;;  %646 = vmatprep.mubr.msk.f32.mxu0 %vm762_vm0, %v761_v0  ;;  %v37_v1 = vld [vmem:[#allocation5] sm:$0x1f]  ;;  %v36_v2 = vld [vmem:[#allocation2] sm:$0xff]  ;;  %v763_v30 = vmov 683565275   ;;  %s769_s1 = smov [#allocation7]  }
  0x27   :  { %629 = vmatprep.subr.mxu1 %v761_v0  ;;  %631 = vmatprep.mubr.msk.f32.mxu1 %vm762_vm0, %v761_v0  ;;  %v44_v3 = vsel %vm42_vm1, %v37_v1, 0  ;;  %v40_v4 = vsel %vm38_vm2, %v36_v2, 0  ;;  %v764_v32 = vmov 2475754826   ;;  %v765_v35 = vmov 2131351028  }
  0x28   :  { %v47_v5 = vand.u32 4294901760, %v44_v3  ;;  %v112_v6 = vand.u32 4294901760, %v40_v4  ;;  %v766_v38 = vmov 2102212464   ;;  %v767_v41 = vmov 920167782  }
  0x29   :  { %v768_v44 = vmov 1326507024   ;;  %s603_s4 = sshll.u32 %s769_s1, 4  ;;  %s604_s4 = int_to_ptr.vmem [resolvable:$true] %s603_s4 }
  0x2a   :  { %v124_v7 = vsub.f32 %v44_v3, %v47_v5  ;;  %645 = vmatpush3.msra.mxu0 %v47_v5  ;;  %v113_v8 = vsub.f32 %v40_v4, %v112_v6  ;;  %630 = vmatpush3.msra.mxu1 %v47_v5  ;;  %s731_s5 = scalar_lea.vmem %s604_s4, 128  ;;  %p736_p3 = scmp.lt.s32.totalorder %s604_s4, %s604_s4 }
  0x2b   :  { %634 = vmatprep.subr.mxu1 %v761_v0  ;;  %649 = vmatprep.subr.mxu0 %v761_v0  ;;  %p732_p2 = scmp.ne.s32.totalorder %s604_s4, %s731_s5  ;;  %p737_p4 = scmp.lt.s32.totalorder %s731_s5, %s731_s5 }
  0x2c   :  { %v114_v9 = vand.u32 4294901760, %v113_v8  ;;  %v125_v10 = vand.u32 4294901760, %v124_v7 }
  0x2d   :  { %p738_p5 = por %p737_p4, %p736_p3 }
  0x2e   :  { %647 = vmatmul.mubr.f32.vlgmr.msra.gmra.mrb[0].mxu0 %v114_v9  ;;  %v115_v11 = vsub.f32 %v113_v8, %v114_v9  ;;  %v126_v12 = vsub.f32 %v124_v7, %v125_v10 }
  0x2f   :  { %650 = vmatpush3.msra.mxu0 %v125_v10  ;;  %651 = vmatprep.mubr.msk.f32.mxu0 %vm762_vm0, %v761_v0  ;;  %p739_p6 = pnand %p738_p5, %p732_p2 }
  0x30   :  { %v116_v13 = vand.u32 4294901760, %v115_v11  ;;  %v127_v14 = vand.u32 4294901760, %v126_v12  ;;  %654 = vmatprep.subr.mxu0 %v761_v0 }
  0x32   :  { %632 = vmatmul.mubr.f32.vlgmr.msra.gmra.mrb[0].mxu1 %v116_v13 }
  0x33   :  { %635 = vmatpush3.msra.mxu1 %v127_v14  ;;  %636 = vmatprep.mubr.msk.f32.mxu1 %vm762_vm0, %v761_v0 }
  0x34   :  { %639 = vmatprep.subr.mxu1 %v761_v0 }
  0x36   :  { %652 = vmatmul.mubr.f32.vlgmr.msra.gmra.mrb[0].mxu0 %v112_v6 }
  0x37   :  { %655 = vmatpush3.msra.mxu0 %v47_v5  ;;  %656 = vmatprep.mubr.msk.f32.mxu0 %vm762_vm0, %v761_v0 }
  0x3a   :  { %637 = vmatmul.mubr.f32.vlgmr.msra.gmra.mrb[0].mxu1 %v112_v6 }
  0x3b   :  { %640 = vmatpush3.msra.mxu1 %v124_v7  ;;  %641 = vmatprep.mubr.msk.f32.mxu1 %vm762_vm0, %v761_v0 }
  0x3e   :  { %657 = vmatmul.mubr.f32.vlgmr.msra.gmra.mrb[0].mxu0 %v112_v6 }
  0x42   :  { %642 = vmatmul.mubr.f32.vlgmr.msra.gmra.mrb[0].mxu1 %v113_v8 }
 0x111   :  { %v488_v15 = vpop.f32.mrb[0].mxu0 }
 0x112   :  { %v658_v16 = vpop.f32.mrb[1].mxu0 }
 0x115   :  { %v268_v17 = vpop.f32.mrb[0].mxu1 }
 0x116   :  { %v815_v18 = vadd.f32 %v488_v15, %v268_v17  ;;  %v643_v19 = vpop.f32.mrb[1].mxu1 }
 0x118   :  { %v495_v20 = vand.u32 2139095040, %v815_v18  ;;  %v492_v24 = vand.u32 2147483647, %v815_v18  ;;  %vm494_vm10 = vcmp.lt.s32.totalorder %v815_v18, 0  ;;  %vm584_vm15 = vweird.f32 %v815_v18 }
 0x11a   :  { %v496_v21 = vshrl.u32 %v495_v20, 23  ;;  %v499_v27 = vand.u32 8388607, %v492_v24  ;;  %vm493_vm11 = vcmp.le.f32.partialorder %v492_v24, 0.7853982 }
 0x11c   :  { %v613_v22 = vadd.s32 4294967169, %v496_v21  ;;  %v500_v46 = vor.u32 8388608, %v499_v27 }
 0x11e   :  { %v502_v23 = vadd.s32 1, %v613_v22  ;;  %v540_v60 = vshll.u32 %v500_v46, 8 }
 0x120   :  { %vm503_vm3 = vcmp.gt.s32.totalorder %v502_v23, 0 }
 0x121   :  { %v504_v25 = vsel %vm503_vm3, %v502_v23, 0 }
 0x122   :  { %v506_v26 = vand.u32 31, %v504_v25  ;;  %v505_v29 = vshrl.u32 %v504_v25, 5 }
 0x124   :  { %v507_v28 = vsub.s32 32, %v506_v26  ;;  %v509_v31 = vshll.u32 %v763_v30, %v506_v26  ;;  %v512_v33 = vshll.u32 %v764_v32, %v506_v26  ;;  %v515_v37 = vshll.u32 %v765_v35, %v506_v26 }
 0x125   :  { %v518_v40 = vshll.u32 %v766_v38, %v506_v26  ;;  %v521_v43 = vshll.u32 %v767_v41, %v506_v26  ;;  %vm524_vm4 = vcmp.lt.s32.totalorder %v505_v29, 1  ;;  %vm527_vm5 = vcmp.lt.s32.totalorder %v505_v29, 4 }
 0x126   :  { %v510_v34 = vshrl.u32 %v764_v32, %v507_v28  ;;  %v513_v36 = vshrl.u32 %v765_v35, %v507_v28  ;;  %v516_v39 = vshrl.u32 %v766_v38, %v507_v28  ;;  %v519_v42 = vshrl.u32 %v767_v41, %v507_v28 }
 0x127   :  { %v522_v45 = vshrl.u32 %v768_v44, %v507_v28  ;;  %v508_v55 = vshrl.u32 %v763_v30, %v507_v28  ;;  %vm526_vm6 = vcmp.lt.s32.totalorder %v505_v29, 3  ;;  %vm525_vm7 = vcmp.lt.s32.totalorder %v505_v29, 2 }
 0x128   :  { %v511_v47 = vor.u32 %v510_v34, %v509_v31  ;;  %v514_v48 = vor.u32 %v513_v36, %v512_v33  ;;  %v517_v49 = vor.u32 %v516_v39, %v515_v37  ;;  %v520_v50 = vor.u32 %v519_v42, %v518_v40 }
 0x129   :  { %v523_v51 = vor.u32 %v522_v45, %v521_v43 }
 0x12a   :  { %v529_v52 = vsel %vm527_vm5, %v517_v49, 2102212464  ;;  %v532_v53 = vsel %vm524_vm4, %v511_v47, %v514_v48  ;;  %v536_v54 = vsel %vm524_vm4, %v514_v48, %v517_v49  ;;  %v533_v56 = vsel %vm527_vm5, %v520_v50, 920167782 }
 0x12b   :  { %v537_v57 = vsel %vm527_vm5, %v523_v51, 1326507024  ;;  %v534_v58 = vsel %vm526_vm6, %v517_v49, %v533_v56  ;;  %v528_v61 = vsel %vm524_vm4, %v508_v55, %v511_v47  ;;  %v530_v62 = vsel %vm526_vm6, %v514_v48, %v529_v52 }
 0x12c   :  { %v538_v59 = vsel %vm526_vm6, %v520_v50, %v537_v57  ;;  %v535_v63 = vsel %vm525_vm7, %v532_v53, %v534_v58  ;;  %v531_v5 = vsel %vm525_vm7, %v528_v61, %v530_v62 }
 0x12d   :  { %v539_v0 = vsel %vm525_vm7, %v536_v54, %v538_v59  ;;  %v824_v3 = vmul.u32.u64.low %v540_v60, %v535_v63  ;;  %v825_v4 = vmul.u32.u64.high %v540_v60, %v535_v63, %v824_v3  ;;  %v547_v7 = vmul.u32 %v540_v60, %v531_v5 }
 0x12e   :  { %v821_v1 = vmul.u32.u64.low %v540_v60, %v539_v0  ;;  %v822_v2 = vmul.u32.u64.high %v540_v60, %v539_v0, %v821_v1 }
 0x12f   :  { %v550_v6 = vadd.s32 1, %v825_v4 }
 0x130   :  { %vm549_vm8 = vc.u32 %v822_v2, %v824_v3  ;;  %v548_v20 = vadd.s32 %v824_v3, %v822_v2 }
 0x131   :  { %v551_v8 = vsel %vm549_vm8, %v550_v6, %v825_v4 }
 0x132   :  { %v552_v9 = vadd.s32 %v551_v8, %v547_v7 }
 0x134   :  { %v553_v10 = vadd.s32 536870912, %v552_v9 }
 0x136   :  { %v554_v11 = vshrl.u32 %v553_v10, 30 }
 0x138   :  { %v555_v12 = vshll.u32 %v554_v11, 30  ;;  %v578_v33 = vsub.s32 4, %v554_v11 }
 0x13a   :  { %v556_v13 = vsub.s32 %v552_v9, %v555_v12  ;;  %v579_v36 = vsel %vm494_vm10, %v578_v33, %v554_v11 }
 0x13b   :  { %v581_v38 = vsel %vm493_vm11, 0, %v579_v36 }
 0x13c   :  { %v558_v14 = vsub.s32 0, %v556_v13  ;;  %v585_v39 = vadd.s32 3, %v581_v38 }
 0x13e   :  { %v614_v15 = vmin.u32 %v558_v14, %v556_v13  ;;  %v586_v40 = vand.u32 3, %v585_v39 }
 0x140   :  { %v560_v16 = vclz %v614_v15  ;;  %vm591_vm12 = vcmp.eq.s32.totalorder %v586_v40, 2  ;;  %vm588_vm13 = vcmp.eq.s32.totalorder %v586_v40, 0  ;;  %vm587_vm14 = vcmp.lt.s32.totalorder %v586_v40, 2 }
 0x142   :  { %v615_v17 = vadd.s32 4294967294, %v560_v16 }
 0x144   :  { %vm616_vm9 = vcmp.lt.s32.totalorder %v615_v17, 0 }
 0x145   :  { %v563_v19 = vsel %vm616_vm9, 0, %v615_v17 }
 0x146   :  { %v564_v21 = vsub.s32 32, %v563_v19  ;;  %v568_v22 = vsub.s32 4294967266, %v563_v19  ;;  %v565_v23 = vshll.u32 %v556_v13, %v563_v19 }
 0x148   :  { %v566_v25 = vshrl.u32 %v548_v20, %v564_v21  ;;  %v569_v26 = vadd.s32 127, %v568_v22 }
 0x14a   :  { %v567_v27 = vor.u32 %v566_v25, %v565_v23  ;;  %v570_v28 = vshll.u32 %v569_v26, 23 }
 0x14c   :  { %v571_v29 = vor.u32 4788187, %v570_v28  ;;  %v574_v31 = vcvt.s32.f32 %v567_v27 }
 0x14e   :  { %v572_v30 = vand.u32 2147483647, %v571_v29 }
 0x150   :  { %v575_v32 = vmul.f32 %v574_v31, %v572_v30 }
 0x152   :  { %v576_v34 = vxor.u32 2147483648, %v575_v32 }
 0x154   :  { %v577_v35 = vsel %vm494_vm10, %v576_v34, %v575_v32 }
 0x155   :  { %v580_v37 = vsel %vm493_vm11, %v815_v18, %v577_v35 }
 0x156   :  { %683 = vcosq.f32 %v580_v37 }
 0x157   :  { %685 = vsinq.f32 %v580_v37 }
 0x160   :  { %v684_v41 = vpop.eup %683 }
 0x161   :  { %v686_v42 = vpop.eup %685  ;;  %v592_v43 = vxor.u32 2147483648, %v684_v41 }
 0x162   :  { %v589_v44 = vxor.u32 2147483648, %v686_v42 }
 0x163   :  { %v593_v45 = vsel %vm591_vm12, %v592_v43, %v686_v42 }
 0x164   :  { %v590_v46 = vsel %vm588_vm13, %v684_v41, %v589_v44 }
 0x165   :  { %v594_v24 = vsel %vm587_vm14, %v590_v46, %v593_v45 }
 0x166   :  { %v595_v47 = vsel %vm584_vm15, nan, %v594_v24 }
 0x167   :  { %596 = vst [vmem:[#allocation7] sm:$0xff] %v595_v47 }
 0x168   :  { %742 = shalt.err (!%p739_p6)
}
 0x169   :  { %s743_s8 = scalar_lea.hbm %s850_s2, 128 }
 0x16a   :  { %p744_p7 = scmp.ne.s32.totalorder %s850_s2, %s743_s8  ;;  %p747_p8 = scmp.lt.u32.totalorder %s743_s8, %s850_s2 }
 0x16c   :  { %p749_p9 = pnand %p747_p8, %p744_p7 }
 0x16e   :  { %752 = shalt.err (!%p749_p9)
}
 0x16f   :  { %606 = dma.vmem_to_hbm [thread:$0]  %s604_s4, 128, %s850_s2, [#allocation4]  }
 0x170   :  { %757 = dma.done.wait [#allocation4], 128  }
 0x171   :  { %758 = vsyncadd [#allocation4], 4294967168 }
 0x172   :  { %610 = vsyncpa [#allocation3], 1 }
 0x173   :  { %611 = vsyncpa [#allocation6], 1 }
 0x174   :  { %612 = vsyncpa [#allocation4], 1 }

</bundles_post_ra>
